<compile_context>
chip_gen: v7x
topology: tpu7x:2x2x1
jax: 0.10.0
libtpu: 0.0.40
codegen_flags: <defaults>
</compile_context>

<pallas_src>
import functools
import math

import numpy as np
import jax
import jax.numpy as jnp
from jax.experimental import pallas as pl
from jax.experimental.pallas import tpu as pltpu

# ---------------- model hyperparameters (small, consistent with the module) ---
EMBED_DIM = 32
NUM_HEADS = 4
HEAD_DIM = EMBED_DIM // NUM_HEADS
BATCH = 2
TGT_LEN = 8
DROPOUT = 0.0          # eval-mode / dropout disabled
IS_DECODER = False     # no KV cache path exercised

LANE = 128             # per-head padded width (vreg lane count)


def whisper_attention_kernel(x_ref, wqkv_ref, wo_ref, bias_ref, out_ref,
                             *, batch, seq, heads):
    """Fused multi-head self-attention, whole (flattened) batch, one step.

    x_ref    : (B*T, E)              flattened hidden states
    wqkv_ref : (E, 3*H*LANE)         [Wq_h0|..|Wq_h{H-1}|Wk_h0|..|Wv_h{H-1}],
                                     each head's d cols zero-padded to LANE;
                                     q part pre-scaled by 1/sqrt(d)
    wo_ref   : (H*LANE, LANE)        per-head 128-row blocks of Wo^T
                                     (rows d..LANE zero, cols E..LANE zero)
    bias_ref : (1, 3*H*LANE + LANE)  [qkv bias (q pre-scaled, k slot zero) | out bias]
    out_ref  : (B*T, LANE)           lane-dense output (cols E..LANE are zero)
    """
    hpad = LANE
    qkv_w = 3 * heads * hpad

    x = x_ref[...]                                            # (B*T, E)
    bqkv = bias_ref[:, :qkv_w]                                # (1, 3*H*LANE)
    bo = bias_ref[:, qkv_w:qkv_w + hpad]                      # (1, LANE)

    # Single fused QKV projection (one MXU matmul, f32 accumulation).
    qkv = jnp.dot(x, wqkv_ref[...],
                  preferred_element_type=jnp.float32) + bqkv  # (B*T, 3*H*LANE)

    # Leading-dim-only reshape (no lane relayout): (B*T, W) -> (B, T, W).
    qkv3 = qkv.reshape(batch, seq, qkv_w)

    acc = jnp.zeros((batch * seq, hpad), jnp.float32)

    # Static loop over heads; every slice below is 128-lane aligned.
    for h in range(heads):
        q_h = qkv3[:, :, h * hpad:(h + 1) * hpad]                             # (B,T,128)
        k_h = qkv3[:, :, (heads + h) * hpad:(heads + h + 1) * hpad]           # (B,T,128)
        v_h = qkv3[:, :, (2 * heads + h) * hpad:(2 * heads + h + 1) * hpad]   # (B,T,128)

        # scores: contract the padded 128-lane head dim (zero lanes add 0)
        s = jnp.einsum("bqd,bkd->bqk", q_h, k_h,
                       preferred_element_type=jnp.float32)                    # (B,T,T)

        # numerically-stable softmax along the key axis
        m = jnp.max(s, axis=-1, keepdims=True)
        p = jnp.exp(s - m)
        denom = jnp.sum(p, axis=-1, keepdims=True)
        r = pl.reciprocal(denom, approx=True)          # EUP vrcp (separate slot)
        r = r * (2.0 - denom * r)                      # one Newton step -> ~1e-8 rel err
        p = p * r

        ctx = jnp.einsum("bqk,bkd->bqd", p, v_h,
                         preferred_element_type=jnp.float32)                  # (B,T,128)

        # per-head output projection; head concat folded into accumulation
        acc = acc + jnp.dot(ctx.reshape(batch * seq, hpad),
                            wo_ref[h * hpad:(h + 1) * hpad, :],
                            preferred_element_type=jnp.float32)               # (B*T,128)

    out_ref[...] = (acc + bo).astype(out_ref.dtype)


def _pack_params(params):
    """Host/XLA-side, loop-invariant weight packing (all padding is exact zeros)."""
    E, H, d = EMBED_DIM, NUM_HEADS, HEAD_DIM
    scale = 1.0 / math.sqrt(d)                        # SDPA default scaling

    wq_t = params["wq"].T * scale                     # fold scale into Wq^T
    wk_t = params["wk"].T
    wv_t = params["wv"].T
    bq = params["bq"] * scale                         # fold scale into bq
    bv = params["bv"]
    wo_t = params["wo"].T                             # (E_in, E_out)
    bo = params["bo"]

    def pad_heads_w(w_t):                             # (E, H*d) -> (E, H*LANE)
        w = w_t.reshape(E, H, d)
        w = jnp.pad(w, ((0, 0), (0, 0), (0, LANE - d)))
        return w.reshape(E, H * LANE)

    def pad_heads_b(b):                               # (1, H*d) -> (1, H*LANE)
        b = b.reshape(1, H, d)
        b = jnp.pad(b, ((0, 0), (0, 0), (0, LANE - d)))
        return b.reshape(1, H * LANE)

    wqkv = jnp.concatenate(
        [pad_heads_w(wq_t), pad_heads_w(wk_t), pad_heads_w(wv_t)],
        axis=1)                                                   # (E, 3*H*LANE)

    bqkv = jnp.concatenate(
        [pad_heads_b(bq),
         jnp.zeros((1, H * LANE), bq.dtype),                      # k_proj has no bias
         pad_heads_b(bv)],
        axis=1)                                                   # (1, 3*H*LANE)

    # Wo^T per head: (d, E) block -> zero-padded (LANE, LANE) block, row-stacked.
    wo_heads = wo_t.reshape(H, d, E)
    wo_heads = jnp.pad(wo_heads, ((0, 0), (0, LANE - d), (0, LANE - E)))
    wo_pad = wo_heads.reshape(H * LANE, LANE)                     # (H*LANE, LANE)

    bo_pad = jnp.pad(bo, ((0, 0), (0, LANE - E)))                 # (1, LANE)

    bias_all = jnp.concatenate([bqkv, bo_pad], axis=1)            # (1, 3*H*LANE + LANE)
    return wqkv, wo_pad, bias_all


def whisper_attention(hidden_states, params):
    """hidden_states: (B, T, E) float32.  Returns (B, T, E)."""
    B, T, E = hidden_states.shape

    wqkv, wo_pad, bias_all = _pack_params(params)
    x2d = hidden_states.reshape(B * T, E)

    vmem_spec = pl.BlockSpec(memory_space=pltpu.MemorySpace.VMEM)

    out_padded = pl.pallas_call(
        functools.partial(whisper_attention_kernel,
                          batch=B, seq=T, heads=NUM_HEADS),
        out_shape=jax.ShapeDtypeStruct((B * T, LANE), hidden_states.dtype),
        in_specs=[vmem_spec] * 4,
        out_specs=vmem_spec,
    )(x2d, wqkv, wo_pad, bias_all)

    return out_padded[:, :E].reshape(B, T, E)


def reference_attention(hidden_states, params):
    """Pure-JAX reference mirroring the PyTorch module (SDPA, no mask)."""
    B, T, E = hidden_states.shape
    H, d = NUM_HEADS, HEAD_DIM
    q = hidden_states @ params["wq"].T + params["bq"][0]
    k = hidden_states @ params["wk"].T
    v = hidden_states @ params["wv"].T + params["bv"][0]

    def shape(x):
        return x.reshape(B, T, H, d).transpose(0, 2, 1, 3)   # (B, H, T, d)

    q, k, v = shape(q), shape(k), shape(v)
    s = jnp.einsum("bhqd,bhkd->bhqk", q, k) / math.sqrt(d)
    p = jax.nn.softmax(s, axis=-1)
    ctx = jnp.einsum("bhqk,bhkd->bhqd", p, v)                 # (B, H, T, d)
    ctx = ctx.transpose(0, 2, 1, 3).reshape(B, T, E)
    return ctx @ params["wo"].T + params["bo"][0]


def init_params(key):
    ks = jax.random.split(key, 7)
    scale = 1.0 / math.sqrt(EMBED_DIM)
    params = {
        "wq": jax.random.uniform(ks[0], (EMBED_DIM, EMBED_DIM), jnp.float32,
                                 -scale, scale),
        "bq": jax.random.uniform(ks[1], (1, EMBED_DIM), jnp.float32, -scale, scale),
        "wk": jax.random.uniform(ks[2], (EMBED_DIM, EMBED_DIM), jnp.float32,
                                 -scale, scale),
        "wv": jax.random.uniform(ks[3], (EMBED_DIM, EMBED_DIM), jnp.float32,
                                 -scale, scale),
        "bv": jax.random.uniform(ks[4], (1, EMBED_DIM), jnp.float32, -scale, scale),
        "wo": jax.random.uniform(ks[5], (EMBED_DIM, EMBED_DIM), jnp.float32,
                                 -scale, scale),
        "bo": jax.random.uniform(ks[6], (1, EMBED_DIM), jnp.float32, -scale, scale),
    }
    return params


if __name__ == "__main__":
    key = jax.random.PRNGKey(0)
    pkey, xkey = jax.random.split(key)
    params = init_params(pkey)
    hidden_states = jax.random.normal(xkey, (BATCH, TGT_LEN, EMBED_DIM),
                                      dtype=jnp.float32)

    out = whisper_attention(hidden_states, params)
    out = jax.block_until_ready(out)

    ref = jax.block_until_ready(reference_attention(hidden_states, params))
    np.testing.assert_allclose(np.asarray(out), np.asarray(ref),
                               rtol=1e-5, atol=1e-5)
    print("KERNEL_OK")
</pallas_src>

<mosaic_0001>
module attributes {stable_mosaic.version = 11 : i64} {
  func.func @whisper_attention_kernel(%arg0: memref<16x32xf32, #tpu.memory_space<vmem>>, %arg1: memref<32x1536xf32, #tpu.memory_space<vmem>>, %arg2: memref<512x128xf32, #tpu.memory_space<vmem>>, %arg3: memref<1x1664xf32, #tpu.memory_space<vmem>>, %arg4: memref<16x128xf32, #tpu.memory_space<vmem>>) attributes {dimension_semantics = [], scalar_prefetch = 0 : i64, scratch_operands = 0 : i64, tpu.core_type = #tpu.core_type<tc>} {
    %c0 = arith.constant 0 : index
    %c0_0 = arith.constant 0 : index
    %0 = vector.load %arg0[%c0, %c0_0] : memref<16x32xf32, #tpu.memory_space<vmem>>, vector<16x32xf32>
    %c0_1 = arith.constant 0 : index
    %c0_2 = arith.constant 0 : index
    %1 = vector.load %arg3[%c0_1, %c0_2] : memref<1x1664xf32, #tpu.memory_space<vmem>>, vector<1x1536xf32>
    %c0_3 = arith.constant 0 : index
    %c1536 = arith.constant 1536 : index
    %2 = vector.load %arg3[%c0_3, %c1536] : memref<1x1664xf32, #tpu.memory_space<vmem>>, vector<1x128xf32>
    %c0_4 = arith.constant 0 : index
    %c0_5 = arith.constant 0 : index
    %3 = vector.load %arg1[%c0_4, %c0_5] : memref<32x1536xf32, #tpu.memory_space<vmem>>, vector<32x1536xf32>
    %cst = arith.constant dense<0.000000e+00> : vector<16x1536xf32>
    %4 = tpu.matmul %0, %3, %cst {dimension_numbers = #tpu.dot_dimension_numbers<[1], [0], [0], [1], [0, 0, 1, 1], [], []>} : vector<16x32xf32>, vector<32x1536xf32>, vector<16x1536xf32> -> vector<16x1536xf32>
    %5 = vector.broadcast %1 : vector<1x1536xf32> to vector<16x1536xf32>
    %6 = arith.addf %4, %5 : vector<16x1536xf32>
    %7 = vector.shape_cast %6 : vector<16x1536xf32> to vector<2x8x1536xf32>
    %cst_6 = arith.constant 0.000000e+00 : f32
    %8 = vector.broadcast %cst_6 : f32 to vector<16x128xf32>
    %9 = vector.extract_strided_slice %7 {offsets = [0, 0, 0], sizes = [2, 8, 128], strides = [1, 1, 1]} : vector<2x8x1536xf32> to vector<2x8x128xf32>
    %10 = vector.extract_strided_slice %7 {offsets = [0, 0, 512], sizes = [2, 8, 128], strides = [1, 1, 1]} : vector<2x8x1536xf32> to vector<2x8x128xf32>
    %11 = vector.extract_strided_slice %7 {offsets = [0, 0, 1024], sizes = [2, 8, 128], strides = [1, 1, 1]} : vector<2x8x1536xf32> to vector<2x8x128xf32>
    "tpu.trace_start"() <{level = 10 : i32, message = "bqd,bkd->bqk"}> : () -> ()
    %cst_7 = arith.constant dense<0.000000e+00> : vector<2x8x8xf32>
    %12 = tpu.matmul %9, %10, %cst_7 {dimension_numbers = #tpu.dot_dimension_numbers<[2], [2], [1], [1], [0, 0, 0, 1, 1, 1], [0], [0]>} : vector<2x8x128xf32>, vector<2x8x128xf32>, vector<2x8x8xf32> -> vector<2x8x8xf32>
    "tpu.trace_stop"() : () -> ()
    %cst_8 = arith.constant dense<0xFF800000> : vector<2x8xf32>
    %13 = vector.multi_reduction <maximumf>, %12, %cst_8 [2] : vector<2x8x8xf32> to vector<2x8xf32>
    %14 = vector.shape_cast %13 : vector<2x8xf32> to vector<2x8x1xf32>
    %15 = vector.broadcast %14 : vector<2x8x1xf32> to vector<2x8x8xf32>
    %16 = arith.subf %12, %15 : vector<2x8x8xf32>
    %17 = math.exp %16 : vector<2x8x8xf32>
    %cst_9 = arith.constant dense<0.000000e+00> : vector<2x8xf32>
    %18 = vector.multi_reduction <add>, %17, %cst_9 [2] : vector<2x8x8xf32> to vector<2x8xf32>
    %19 = vector.shape_cast %18 : vector<2x8xf32> to vector<2x8x1xf32>
    %20 = tpu.reciprocal %19 {approx = true} : vector<2x8x1xf32> -> vector<2x8x1xf32>
    %21 = arith.mulf %19, %20 : vector<2x8x1xf32>
    %cst_10 = arith.constant 2.000000e+00 : f32
    %22 = vector.broadcast %cst_10 : f32 to vector<2x8x1xf32>
    %23 = arith.subf %22, %21 : vector<2x8x1xf32>
    %24 = arith.mulf %20, %23 : vector<2x8x1xf32>
    %25 = vector.broadcast %24 : vector<2x8x1xf32> to vector<2x8x8xf32>
    %26 = arith.mulf %17, %25 : vector<2x8x8xf32>
    "tpu.trace_start"() <{level = 10 : i32, message = "bqk,bkd->bqd"}> : () -> ()
    %cst_11 = arith.constant dense<0.000000e+00> : vector<2x8x128xf32>
    %27 = tpu.matmul %26, %11, %cst_11 {dimension_numbers = #tpu.dot_dimension_numbers<[2], [1], [1], [2], [0, 0, 0, 1, 1, 2], [0], [0]>} : vector<2x8x8xf32>, vector<2x8x128xf32>, vector<2x8x128xf32> -> vector<2x8x128xf32>
    "tpu.trace_stop"() : () -> ()
    %28 = vector.shape_cast %27 : vector<2x8x128xf32> to vector<16x128xf32>
    %c0_12 = arith.constant 0 : index
    %c0_13 = arith.constant 0 : index
    %29 = vector.load %arg2[%c0_12, %c0_13] : memref<512x128xf32, #tpu.memory_space<vmem>>, vector<128x128xf32>
    %cst_14 = arith.constant dense<0.000000e+00> : vector<16x128xf32>
    %30 = tpu.matmul %28, %29, %cst_14 {dimension_numbers = #tpu.dot_dimension_numbers<[1], [0], [0], [1], [0, 0, 1, 1], [], []>} : vector<16x128xf32>, vector<128x128xf32>, vector<16x128xf32> -> vector<16x128xf32>
    %31 = arith.addf %8, %30 : vector<16x128xf32>
    %32 = vector.extract_strided_slice %7 {offsets = [0, 0, 128], sizes = [2, 8, 128], strides = [1, 1, 1]} : vector<2x8x1536xf32> to vector<2x8x128xf32>
    %33 = vector.extract_strided_slice %7 {offsets = [0, 0, 640], sizes = [2, 8, 128], strides = [1, 1, 1]} : vector<2x8x1536xf32> to vector<2x8x128xf32>
    %34 = vector.extract_strided_slice %7 {offsets = [0, 0, 1152], sizes = [2, 8, 128], strides = [1, 1, 1]} : vector<2x8x1536xf32> to vector<2x8x128xf32>
    "tpu.trace_start"() <{level = 10 : i32, message = "bqd,bkd->bqk"}> : () -> ()
    %cst_15 = arith.constant dense<0.000000e+00> : vector<2x8x8xf32>
    %35 = tpu.matmul %32, %33, %cst_15 {dimension_numbers = #tpu.dot_dimension_numbers<[2], [2], [1], [1], [0, 0, 0, 1, 1, 1], [0], [0]>} : vector<2x8x128xf32>, vector<2x8x128xf32>, vector<2x8x8xf32> -> vector<2x8x8xf32>
    "tpu.trace_stop"() : () -> ()
    %cst_16 = arith.constant dense<0xFF800000> : vector<2x8xf32>
    %36 = vector.multi_reduction <maximumf>, %35, %cst_16 [2] : vector<2x8x8xf32> to vector<2x8xf32>
    %37 = vector.shape_cast %36 : vector<2x8xf32> to vector<2x8x1xf32>
    %38 = vector.broadcast %37 : vector<2x8x1xf32> to vector<2x8x8xf32>
    %39 = arith.subf %35, %38 : vector<2x8x8xf32>
    %40 = math.exp %39 : vector<2x8x8xf32>
    %cst_17 = arith.constant dense<0.000000e+00> : vector<2x8xf32>
    %41 = vector.multi_reduction <add>, %40, %cst_17 [2] : vector<2x8x8xf32> to vector<2x8xf32>
    %42 = vector.shape_cast %41 : vector<2x8xf32> to vector<2x8x1xf32>
    %43 = tpu.reciprocal %42 {approx = true} : vector<2x8x1xf32> -> vector<2x8x1xf32>
    %44 = arith.mulf %42, %43 : vector<2x8x1xf32>
    %cst_18 = arith.constant 2.000000e+00 : f32
    %45 = vector.broadcast %cst_18 : f32 to vector<2x8x1xf32>
    %46 = arith.subf %45, %44 : vector<2x8x1xf32>
    %47 = arith.mulf %43, %46 : vector<2x8x1xf32>
    %48 = vector.broadcast %47 : vector<2x8x1xf32> to vector<2x8x8xf32>
    %49 = arith.mulf %40, %48 : vector<2x8x8xf32>
    "tpu.trace_start"() <{level = 10 : i32, message = "bqk,bkd->bqd"}> : () -> ()
    %cst_19 = arith.constant dense<0.000000e+00> : vector<2x8x128xf32>
    %50 = tpu.matmul %49, %34, %cst_19 {dimension_numbers = #tpu.dot_dimension_numbers<[2], [1], [1], [2], [0, 0, 0, 1, 1, 2], [0], [0]>} : vector<2x8x8xf32>, vector<2x8x128xf32>, vector<2x8x128xf32> -> vector<2x8x128xf32>
    "tpu.trace_stop"() : () -> ()
    %51 = vector.shape_cast %50 : vector<2x8x128xf32> to vector<16x128xf32>
    %c128 = arith.constant 128 : index
    %c0_20 = arith.constant 0 : index
    %52 = vector.load %arg2[%c128, %c0_20] : memref<512x128xf32, #tpu.memory_space<vmem>>, vector<128x128xf32>
    %cst_21 = arith.constant dense<0.000000e+00> : vector<16x128xf32>
    %53 = tpu.matmul %51, %52, %cst_21 {dimension_numbers = #tpu.dot_dimension_numbers<[1], [0], [0], [1], [0, 0, 1, 1], [], []>} : vector<16x128xf32>, vector<128x128xf32>, vector<16x128xf32> -> vector<16x128xf32>
    %54 = arith.addf %31, %53 : vector<16x128xf32>
    %55 = vector.extract_strided_slice %7 {offsets = [0, 0, 256], sizes = [2, 8, 128], strides = [1, 1, 1]} : vector<2x8x1536xf32> to vector<2x8x128xf32>
    %56 = vector.extract_strided_slice %7 {offsets = [0, 0, 768], sizes = [2, 8, 128], strides = [1, 1, 1]} : vector<2x8x1536xf32> to vector<2x8x128xf32>
    %57 = vector.extract_strided_slice %7 {offsets = [0, 0, 1280], sizes = [2, 8, 128], strides = [1, 1, 1]} : vector<2x8x1536xf32> to vector<2x8x128xf32>
    "tpu.trace_start"() <{level = 10 : i32, message = "bqd,bkd->bqk"}> : () -> ()
    %cst_22 = arith.constant dense<0.000000e+00> : vector<2x8x8xf32>
    %58 = tpu.matmul %55, %56, %cst_22 {dimension_numbers = #tpu.dot_dimension_numbers<[2], [2], [1], [1], [0, 0, 0, 1, 1, 1], [0], [0]>} : vector<2x8x128xf32>, vector<2x8x128xf32>, vector<2x8x8xf32> -> vector<2x8x8xf32>
    "tpu.trace_stop"() : () -> ()
    %cst_23 = arith.constant dense<0xFF800000> : vector<2x8xf32>
    %59 = vector.multi_reduction <maximumf>, %58, %cst_23 [2] : vector<2x8x8xf32> to vector<2x8xf32>
    %60 = vector.shape_cast %59 : vector<2x8xf32> to vector<2x8x1xf32>
    %61 = vector.broadcast %60 : vector<2x8x1xf32> to vector<2x8x8xf32>
    %62 = arith.subf %58, %61 : vector<2x8x8xf32>
    %63 = math.exp %62 : vector<2x8x8xf32>
    %cst_24 = arith.constant dense<0.000000e+00> : vector<2x8xf32>
    %64 = vector.multi_reduction <add>, %63, %cst_24 [2] : vector<2x8x8xf32> to vector<2x8xf32>
    %65 = vector.shape_cast %64 : vector<2x8xf32> to vector<2x8x1xf32>
    %66 = tpu.reciprocal %65 {approx = true} : vector<2x8x1xf32> -> vector<2x8x1xf32>
    %67 = arith.mulf %65, %66 : vector<2x8x1xf32>
    %cst_25 = arith.constant 2.000000e+00 : f32
    %68 = vector.broadcast %cst_25 : f32 to vector<2x8x1xf32>
    %69 = arith.subf %68, %67 : vector<2x8x1xf32>
    %70 = arith.mulf %66, %69 : vector<2x8x1xf32>
    %71 = vector.broadcast %70 : vector<2x8x1xf32> to vector<2x8x8xf32>
    %72 = arith.mulf %63, %71 : vector<2x8x8xf32>
    "tpu.trace_start"() <{level = 10 : i32, message = "bqk,bkd->bqd"}> : () -> ()
    %cst_26 = arith.constant dense<0.000000e+00> : vector<2x8x128xf32>
    %73 = tpu.matmul %72, %57, %cst_26 {dimension_numbers = #tpu.dot_dimension_numbers<[2], [1], [1], [2], [0, 0, 0, 1, 1, 2], [0], [0]>} : vector<2x8x8xf32>, vector<2x8x128xf32>, vector<2x8x128xf32> -> vector<2x8x128xf32>
    "tpu.trace_stop"() : () -> ()
    %74 = vector.shape_cast %73 : vector<2x8x128xf32> to vector<16x128xf32>
    %c256 = arith.constant 256 : index
    %c0_27 = arith.constant 0 : index
    %75 = vector.load %arg2[%c256, %c0_27] : memref<512x128xf32, #tpu.memory_space<vmem>>, vector<128x128xf32>
    %cst_28 = arith.constant dense<0.000000e+00> : vector<16x128xf32>
    %76 = tpu.matmul %74, %75, %cst_28 {dimension_numbers = #tpu.dot_dimension_numbers<[1], [0], [0], [1], [0, 0, 1, 1], [], []>} : vector<16x128xf32>, vector<128x128xf32>, vector<16x128xf32> -> vector<16x128xf32>
    %77 = arith.addf %54, %76 : vector<16x128xf32>
    %78 = vector.extract_strided_slice %7 {offsets = [0, 0, 384], sizes = [2, 8, 128], strides = [1, 1, 1]} : vector<2x8x1536xf32> to vector<2x8x128xf32>
    %79 = vector.extract_strided_slice %7 {offsets = [0, 0, 896], sizes = [2, 8, 128], strides = [1, 1, 1]} : vector<2x8x1536xf32> to vector<2x8x128xf32>
    %80 = vector.extract_strided_slice %7 {offsets = [0, 0, 1408], sizes = [2, 8, 128], strides = [1, 1, 1]} : vector<2x8x1536xf32> to vector<2x8x128xf32>
    "tpu.trace_start"() <{level = 10 : i32, message = "bqd,bkd->bqk"}> : () -> ()
    %cst_29 = arith.constant dense<0.000000e+00> : vector<2x8x8xf32>
    %81 = tpu.matmul %78, %79, %cst_29 {dimension_numbers = #tpu.dot_dimension_numbers<[2], [2], [1], [1], [0, 0, 0, 1, 1, 1], [0], [0]>} : vector<2x8x128xf32>, vector<2x8x128xf32>, vector<2x8x8xf32> -> vector<2x8x8xf32>
    "tpu.trace_stop"() : () -> ()
    %cst_30 = arith.constant dense<0xFF800000> : vector<2x8xf32>
    %82 = vector.multi_reduction <maximumf>, %81, %cst_30 [2] : vector<2x8x8xf32> to vector<2x8xf32>
    %83 = vector.shape_cast %82 : vector<2x8xf32> to vector<2x8x1xf32>
    %84 = vector.broadcast %83 : vector<2x8x1xf32> to vector<2x8x8xf32>
    %85 = arith.subf %81, %84 : vector<2x8x8xf32>
    %86 = math.exp %85 : vector<2x8x8xf32>
    %cst_31 = arith.constant dense<0.000000e+00> : vector<2x8xf32>
    %87 = vector.multi_reduction <add>, %86, %cst_31 [2] : vector<2x8x8xf32> to vector<2x8xf32>
    %88 = vector.shape_cast %87 : vector<2x8xf32> to vector<2x8x1xf32>
    %89 = tpu.reciprocal %88 {approx = true} : vector<2x8x1xf32> -> vector<2x8x1xf32>
    %90 = arith.mulf %88, %89 : vector<2x8x1xf32>
    %cst_32 = arith.constant 2.000000e+00 : f32
    %91 = vector.broadcast %cst_32 : f32 to vector<2x8x1xf32>
    %92 = arith.subf %91, %90 : vector<2x8x1xf32>
    %93 = arith.mulf %89, %92 : vector<2x8x1xf32>
    %94 = vector.broadcast %93 : vector<2x8x1xf32> to vector<2x8x8xf32>
    %95 = arith.mulf %86, %94 : vector<2x8x8xf32>
    "tpu.trace_start"() <{level = 10 : i32, message = "bqk,bkd->bqd"}> : () -> ()
    %cst_33 = arith.constant dense<0.000000e+00> : vector<2x8x128xf32>
    %96 = tpu.matmul %95, %80, %cst_33 {dimension_numbers = #tpu.dot_dimension_numbers<[2], [1], [1], [2], [0, 0, 0, 1, 1, 2], [0], [0]>} : vector<2x8x8xf32>, vector<2x8x128xf32>, vector<2x8x128xf32> -> vector<2x8x128xf32>
    "tpu.trace_stop"() : () -> ()
    %97 = vector.shape_cast %96 : vector<2x8x128xf32> to vector<16x128xf32>
    %c384 = arith.constant 384 : index
    %c0_34 = arith.constant 0 : index
    %98 = vector.load %arg2[%c384, %c0_34] : memref<512x128xf32, #tpu.memory_space<vmem>>, vector<128x128xf32>
    %cst_35 = arith.constant dense<0.000000e+00> : vector<16x128xf32>
    %99 = tpu.matmul %97, %98, %cst_35 {dimension_numbers = #tpu.dot_dimension_numbers<[1], [0], [0], [1], [0, 0, 1, 1], [], []>} : vector<16x128xf32>, vector<128x128xf32>, vector<16x128xf32> -> vector<16x128xf32>
    %100 = arith.addf %77, %99 : vector<16x128xf32>
    %101 = vector.broadcast %2 : vector<1x128xf32> to vector<16x128xf32>
    %102 = arith.addf %100, %101 : vector<16x128xf32>
    %c0_36 = arith.constant 0 : index
    %c0_37 = arith.constant 0 : index
    %103 = vector.load %arg4[%c0_36, %c0_37] : memref<16x128xf32, #tpu.memory_space<vmem>>, vector<16x128xf32>
    tpu.vector_store %arg4[%c0_36, %c0_37], %102 {strides = array<i32>} : memref<16x128xf32, #tpu.memory_space<vmem>>, vector<16x128xf32>,
    return
  }
}

</mosaic_0001>

<bundles_post_ra>
// kernel: tpu_custom_call.1
= control target key start
LH: loop header
LB: loop body
LE: loop exit
PB: predicated region body
PF: predicated region fallthrough
CT: control target
= control target key end

     0   :  { %9 = vsyncpa [#allocation3], 0  ;;  %s3309_s0 = inlined_call_operand.hbm [shape: f32[16,32], index: 0, kind: input, shape index: {}]   ;;  %s3310_s1 = inlined_call_operand.hbm [shape: f32[32,1536], index: 1, kind: input, shape index: {}]   ;;  %s3311_s2 = inlined_call_operand.hbm [shape: f32[512,128], index: 2, kind: input, shape index: {}]   ;;  %s3312_s3 = inlined_call_operand.hbm [shape: f32[1,1664], index: 3, kind: input, shape index: {}]   ;;  %s3313_s4 = inlined_call_operand.hbm [shape: f32[16,128], index: 4, kind: output, shape index: {}]  }
   0x1   :  { %10 = vsyncpa [#allocation6], 0 }
   0x2   :  { %11 = vsyncpa [#allocation9], 0 }
   0x3   :  { %12 = vsyncpa [#allocation4], 0  ;;  %s2997_s15 = smov [#allocation5]   ;;  %s2879_s19 = scalar_lea.hbm %s3310_s1, 6144 }
   0x4   :  { %s30_s16 = sshll.u32 %s2997_s15, 4  ;;  %p2880_p0 = scmp.ne.s32.totalorder %s3310_s1, %s2879_s19  ;;  %s31_s16 = int_to_ptr.vmem [resolvable:$true] %s30_s16 }
   0x5   :  { %p2883_p1 = scmp.lt.u32.totalorder %s2879_s19, %s3310_s1 }
   0x7   :  { %p2885_p2 = pnand %p2883_p1, %p2880_p0 }
   0x9   :  { %2888 = shalt.err (!%p2885_p2)
}
   0xa   :  { %s2889_s24 = scalar_lea.vmem %s31_s16, 6144  ;;  %p2894_p4 = scmp.lt.s32.totalorder %s31_s16, %s31_s16 }
   0xb   :  { %p2890_p3 = scmp.ne.s32.totalorder %s31_s16, %s2889_s24  ;;  %p2895_p5 = scmp.lt.s32.totalorder %s2889_s24, %s2889_s24 }
   0xd   :  { %p2896_p6 = por %p2895_p5, %p2894_p4 }
   0xf   :  { %p2897_p7 = pnand %p2896_p6, %p2890_p3 }
  0x11   :  { %2900 = shalt.err (!%p2897_p7)
}
  0x12   :  { %s2998_s25 = smov 1536   ;;  %s2999_s26 = smov 96  }
  0x13   :  { %36 = dma.hbm_to_vmem [thread:$0]  %s3310_s1, 6144, %s31_s16, [#allocation6], %s2998_s25, %s2998_s25, %s2999_s26  }
  0x14   :  { %s3000_s29 = smov [#allocation2]   ;;  %s2901_s7 = scalar_lea.hbm %s3309_s0, 256 }
  0x15   :  { %s18_s30 = sshll.u32 %s3000_s29, 4  ;;  %p2902_p8 = scmp.ne.s32.totalorder %s3309_s0, %s2901_s7  ;;  %s19_s30 = int_to_ptr.vmem [resolvable:$true] %s18_s30 }
  0x16   :  { %p2905_p9 = scmp.lt.u32.totalorder %s2901_s7, %s3309_s0 }
  0x18   :  { %p2907_p10 = pnand %p2905_p9, %p2902_p8 }
  0x1a   :  { %2910 = shalt.err (!%p2907_p10)
}
  0x1b   :  { %s2911_s12 = scalar_lea.vmem %s19_s30, 256  ;;  %p2916_p12 = scmp.lt.s32.totalorder %s19_s30, %s19_s30 }
  0x1c   :  { %p2912_p11 = scmp.ne.s32.totalorder %s19_s30, %s2911_s12  ;;  %p2917_p13 = scmp.lt.s32.totalorder %s2911_s12, %s2911_s12 }
  0x1e   :  { %p2918_p0 = por %p2917_p13, %p2916_p12 }
  0x20   :  { %p2919_p1 = pnand %p2918_p0, %p2912_p11 }
  0x22   :  { %2922 = shalt.err (!%p2919_p1)
}
  0x23   :  { %s3001_s1 = smov 128   ;;  %s3002_s13 = smov 8  }
  0x24   :  { %24 = dma.hbm_to_vmem [thread:$0]  %s3309_s0, 256, %s19_s30, [#allocation3], %s3001_s1, %s3001_s1, %s3002_s13  }
  0x25   :  { %s3003_s16 = smov [#allocation7]   ;;  %s3004_s18 = smov [#allocation8]  }
  0x26   :  { %s42_s17 = sshll.u32 %s3003_s16, 4  ;;  %s55_s19 = sshll.u32 %s3004_s18, 4  ;;  %s43_s17 = int_to_ptr.vmem [resolvable:$true] %s42_s17  ;;  %s56_s19 = int_to_ptr.vmem [resolvable:$true] %s55_s19 }
  0x27   :  { %s2923_s22 = scalar_lea.hbm %s3311_s2, 8192 }
  0x28   :  { %p2924_p2 = scmp.ne.s32.totalorder %s3311_s2, %s2923_s22  ;;  %p2927_p3 = scmp.lt.u32.totalorder %s2923_s22, %s3311_s2 }
  0x2a   :  { %p2929_p4 = pnand %p2927_p3, %p2924_p2 }
  0x2c   :  { %2932 = shalt.err (!%p2929_p4)
}
  0x2d   :  { %s2933_s0 = scalar_lea.vmem %s43_s17, 8192  ;;  %p2938_p6 = scmp.lt.s32.totalorder %s43_s17, %s43_s17 }
  0x2e   :  { %p2934_p5 = scmp.ne.s32.totalorder %s43_s17, %s2933_s0  ;;  %p2939_p7 = scmp.lt.s32.totalorder %s2933_s0, %s2933_s0 }
  0x30   :  { %p2940_p8 = por %p2939_p7, %p2938_p6 }
  0x32   :  { %p2941_p9 = pnand %p2940_p8, %p2934_p5 }
  0x34   :  { %2944 = shalt.err (!%p2941_p9)
}
  0x35   :  { %48 = dma.hbm_to_vmem [thread:$0]  %s3311_s2, 8192, %s43_s17, [#allocation6], %s3001_s1, %s3001_s1, %s3002_s13  }
  0x36   :  { %s2945_s5 = scalar_lea.hbm %s3312_s3, 208 }
  0x37   :  { %p2946_p10 = scmp.ne.s32.totalorder %s3312_s3, %s2945_s5  ;;  %p2949_p11 = scmp.lt.u32.totalorder %s2945_s5, %s3312_s3 }
  0x39   :  { %p2951_p12 = pnand %p2949_p11, %p2946_p10 }
  0x3b   :  { %2954 = shalt.err (!%p2951_p12)
}
  0x3c   :  { %s2955_s10 = scalar_lea.vmem %s56_s19, 208  ;;  %s2959_s11 = scalar_lea.vmem %s56_s19, 224 }
  0x3d   :  { %p2956_p13 = scmp.ne.s32.totalorder %s56_s19, %s2955_s10  ;;  %p2960_p0 = scmp.lt.s32.totalorder %s56_s19, %s56_s19 }
  0x3e   :  { %p2961_p1 = scmp.lt.s32.totalorder %s2959_s11, %s2955_s10 }
  0x40   :  { %p2962_p2 = por %p2961_p1, %p2960_p0 }
  0x42   :  { %p2963_p3 = pnand %p2962_p2, %p2956_p13 }
  0x44   :  { %2966 = shalt.err (!%p2963_p3)
}
  0x45   :  { %58 = dma.hbm_to_vmem [thread:$0]  %s3312_s3, 208, %s56_s19, [#allocation9]  }
  0x46   :  { %2989 = dma.done.wait [#allocation3], 256  }
  0x47   :  { %2990 = vsyncadd [#allocation3], 4294967040 }
  0x48   :  { %2991 = dma.done.wait [#allocation6], 14336  }
  0x49   :  { %2992 = vsyncadd [#allocation6], 4294952960 }
  0x4a   :  { %2993 = dma.done.wait [#allocation9], 208  }
  0x4b   :  { %2994 = vsyncadd [#allocation9], 4294967088  ;;  %v3005_v0 = vmov 0.0   ;;  %v77_v1 = vld [vmem:[#allocation5 + $0x8] sm:$0xff]  ;;  %v76_v3 = vld [vmem:[#allocation5] sm:$0xff]  ;;  %vm186_vm0 = vcmask 261120  }
  0x4c   :  { %257 = vmatprep.mubr.f32.mxu1 %v3005_v0  ;;  %565 = vmatprep.mubr.f32.mxu0 %v3005_v0  ;;  %v89_v2 = vld [vmem:[#allocation5 + $0x68] sm:$0xff]  ;;  %v88_v5 = vld [vmem:[#allocation5 + $0x60] sm:$0xff]  ;;  %v79_v12 = vld [vmem:[#allocation5 + $0x18] sm:$0xff]  ;;  %vm3006_vm1 = vmmov 0   ;;  %vm795_vm2 = vcmask 64512   ;;  %s3007_s3 = smov [#allocation10]  }
  0x4d   :  { %v2654_v4 = vpack.c.bf16 %v89_v2, %v77_v1  ;;  %v101_v6 = vld [vmem:[#allocation5 + $0xc8] sm:$0xff]  ;;  %v2656_v8 = vpack.c.bf16 %v88_v5, %v76_v3  ;;  %v100_v10 = vld [vmem:[#allocation5 + $0xc0] sm:$0xff]  ;;  %v91_v13 = vld [vmem:[#allocation5 + $0x78] sm:$0xff]  ;;  %s2295_s14 = sshll.u32 %s3007_s3, 4  ;;  %s2296_s14 = int_to_ptr.vmem [resolvable:$true] %s2295_s14 }
  0x4e   :  { %v113_v7 = vld [vmem:[#allocation5 + $0x128] sm:$0xff]  ;;  %v112_v11 = vld [vmem:[#allocation5 + $0x120] sm:$0xff]  ;;  %v2662_v15 = vpack.c.bf16 %v91_v13, %v79_v12  ;;  %v78_v16 = vld [vmem:[#allocation5 + $0x10] sm:$0xff]  ;;  %s2967_s15 = scalar_lea.vmem %s2296_s14, 256  ;;  %p2972_p5 = scmp.lt.s32.totalorder %s2296_s14, %s2296_s14 }
  0x4f   :  { %v2658_v9 = vpack.c.bf16 %v113_v7, %v101_v6  ;;  %2655 = vmatprep.subr.bf16.mxu1 %v2654_v4  ;;  %v2660_v14 = vpack.c.bf16 %v112_v11, %v100_v10  ;;  %v90_v17 = vld [vmem:[#allocation5 + $0x70] sm:$0xff]  ;;  %v103_v18 = vld [vmem:[#allocation5 + $0xd8] sm:$0xff]  ;;  %v81_v25 = vld [vmem:[#allocation5 + $0x28] sm:$0xff]  ;;  %p2968_p4 = scmp.ne.s32.totalorder %s2296_s14, %s2967_s15  ;;  %p2973_p6 = scmp.lt.s32.totalorder %s2967_s15, %s2967_s15 }
  0x50   :  { %2657 = vmatpush1.bf16.msra.mxu1 %v2656_v8  ;;  %v115_v19 = vld [vmem:[#allocation5 + $0x138] sm:$0xff]  ;;  %v3089_v20 = vld [vmem:[#allocation2] sm:$0xff]  ;;  %v2664_v21 = vpack.c.bf16 %v90_v17, %v78_v16  ;;  %v93_v26 = vld [vmem:[#allocation5 + $0x88] sm:$0xff] }
  0x51   :  { %2659 = vmatprep.subr.bf16.mxu1 %v2658_v9  ;;  %v2666_v22 = vpack.c.bf16 %v115_v19, %v103_v18  ;;  %v102_v23 = vld [vmem:[#allocation5 + $0xd0] sm:$0xff]  ;;  %v3094_v27 = vld [vmem:[#allocation2 + $0x8] sm:$0xff]  ;;  %v2670_v29 = vpack.c.bf16 %v93_v26, %v81_v25  ;;  %v80_v30 = vld [vmem:[#allocation5 + $0x20] sm:$0xff]  ;;  %p2974_p7 = por %p2973_p6, %p2972_p5 }
  0x52   :  { %v114_v24 = vld [vmem:[#allocation5 + $0x130] sm:$0xff]  ;;  %v92_v31 = vld [vmem:[#allocation5 + $0x80] sm:$0xff]  ;;  %v105_v32 = vld [vmem:[#allocation5 + $0xe8] sm:$0xff] }
  0x53   :  { %v2668_v28 = vpack.c.bf16 %v114_v24, %v102_v23  ;;  %v117_v33 = vld [vmem:[#allocation5 + $0x148] sm:$0xff]  ;;  %v2672_v34 = vpack.c.bf16 %v92_v31, %v80_v30  ;;  %v104_v36 = vld [vmem:[#allocation5 + $0xe0] sm:$0xff]  ;;  %v83_v39 = vld [vmem:[#allocation5 + $0x38] sm:$0xff]  ;;  %p2975_p8 = pnand %p2974_p7, %p2968_p4 }
  0x54   :  { %2661 = vmatpush1.bf16.msra.mxu1 %v2660_v14  ;;  %v2674_v35 = vpack.c.bf16 %v117_v33, %v105_v32  ;;  %v116_v37 = vld [vmem:[#allocation5 + $0x140] sm:$0xff]  ;;  %v95_v40 = vld [vmem:[#allocation5 + $0x98] sm:$0xff]  ;;  %v82_v42 = vld [vmem:[#allocation5 + $0x30] sm:$0xff]  ;;  %v126_v14 = vlaneseq }
  0x55   :  { %2663 = vmatprep.subr.bf16.mxu1 %v2662_v15  ;;  %v2676_v38 = vpack.c.bf16 %v116_v37, %v104_v36  ;;  %v2678_v41 = vpack.c.bf16 %v95_v40, %v83_v39  ;;  %v94_v43 = vld [vmem:[#allocation5 + $0x90] sm:$0xff]  ;;  %v107_v45 = vld [vmem:[#allocation5 + $0xf8] sm:$0xff]  ;;  %v85_v47 = vld [vmem:[#allocation5 + $0x48] sm:$0xff] }
  0x56   :  { %v2680_v44 = vpack.c.bf16 %v94_v43, %v82_v42  ;;  %v119_v46 = vld [vmem:[#allocation5 + $0x158] sm:$0xff]  ;;  %v97_v49 = vld [vmem:[#allocation5 + $0xa8] sm:$0xff]  ;;  %v106_v50 = vld [vmem:[#allocation5 + $0xf0] sm:$0xff]  ;;  %v3137_v17 = vshrl.u32 %v126_v14, 7 }
  0x57   :  { %2309 = vmatmul.mubr.msk.f32.vlgmr.msra.gmra.mrb[0].mxu1 %vm186_vm0, %v3089_v20  ;;  %v2682_v48 = vpack.c.bf16 %v119_v46, %v107_v45  ;;  %v118_v51 = vld [vmem:[#allocation5 + $0x150] sm:$0xff]  ;;  %v2686_v52 = vpack.c.bf16 %v97_v49, %v85_v47  ;;  %v84_v54 = vld [vmem:[#allocation5 + $0x40] sm:$0xff]  ;;  %v109_v57 = vld [vmem:[#allocation5 + $0x108] sm:$0xff] }
  0x58   :  { %2665 = vmatpush1.bf16.msra.mxu1 %v2664_v21  ;;  %263 = vmatprep.mubr.f32.mxu1 %v3005_v0  ;;  %v2684_v53 = vpack.c.bf16 %v118_v51, %v106_v50  ;;  %v96_v55 = vld [vmem:[#allocation5 + $0xa0] sm:$0xff]  ;;  %v121_v58 = vld [vmem:[#allocation5 + $0x168] sm:$0xff]  ;;  %v87_v59 = vld [vmem:[#allocation5 + $0x58] sm:$0xff]  ;;  %v132_v37 = vsub.s32 1, %v3137_v17  ;;  %v140_v43 = vsub.s32 3, %v3137_v17 }
  0x59   :  { %2667 = vmatprep.subr.bf16.mxu1 %v2666_v22  ;;  %v2688_v56 = vpack.c.bf16 %v96_v55, %v84_v54  ;;  %2687 = vmatprep.subr.bf16.mxu0 %v2686_v52  ;;  %v2690_v60 = vpack.c.bf16 %v121_v58, %v109_v57  ;;  %v99_v61 = vld [vmem:[#allocation5 + $0xb8] sm:$0xff]  ;;  %v108_v62 = vld [vmem:[#allocation5 + $0x100] sm:$0xff]  ;;  %v86_v3 = vld [vmem:[#allocation5 + $0x50] sm:$0xff]  ;;  %v128_v22 = vsub.s32 0, %v3137_v17 }
  0x5a   :  { %v120_v63 = vld [vmem:[#allocation5 + $0x160] sm:$0xff]  ;;  %v2694_v1 = vpack.c.bf16 %v99_v61, %v87_v59  ;;  %v98_v4 = vld [vmem:[#allocation5 + $0xb0] sm:$0xff]  ;;  %v111_v6 = vld [vmem:[#allocation5 + $0x118] sm:$0xff] }
  0x5b   :  { %2310 = vmatmul.mubr.msk.f32.gmra.mrb[2].mxu1 %vm186_vm0, %v3094_v27  ;;  %2689 = vmatpush1.bf16.msra.mxu0 %v2688_v56  ;;  %v2692_v2 = vpack.c.bf16 %v120_v63, %v108_v62  ;;  %v2696_v5 = vpack.c.bf16 %v98_v4, %v86_v3  ;;  %v123_v7 = vld [vmem:[#allocation5 + $0x178] sm:$0xff]  ;;  %v110_v9 = vld [vmem:[#allocation5 + $0x110] sm:$0xff]  ;;  %v3144_v21 = vld [vmem:[#allocation8] sm:$0xff] }
  0x5c   :  { %2669 = vmatpush1.bf16.msra.mxu1 %v2668_v28  ;;  %334 = vmatprep.mubr.f32.mxu1 %v3005_v0  ;;  %v2698_v8 = vpack.c.bf16 %v123_v7, %v111_v6  ;;  %v122_v10 = vld [vmem:[#allocation5 + $0x170] sm:$0xff]  ;;  %v129_v26 = vrot.slane %v3144_v21, %v128_v22 }
  0x5d   :  { %2671 = vmatprep.subr.bf16.mxu1 %v2670_v29  ;;  %2691 = vmatprep.subr.bf16.mxu0 %v2690_v60  ;;  %v2700_v11 = vpack.c.bf16 %v122_v10, %v110_v9 }
  0x5f   :  { %2311 = vmatmul.mubr.msk.f32.vlgmr.msra.gmra.mrb[4].mxu1 %vm186_vm0, %v3089_v20  ;;  %2693 = vmatpush1.bf16.msra.mxu0 %v2692_v2 }
  0x60   :  { %2673 = vmatpush1.bf16.msra.mxu1 %v2672_v34  ;;  %340 = vmatprep.mubr.f32.mxu1 %v3005_v0 }
  0x61   :  { %2675 = vmatprep.subr.bf16.mxu1 %v2674_v35  ;;  %2434 = vmatprep.subr.mxu0 %v3005_v0  ;;  %v74_v35 = vld [vmem:[#allocation8 + $0x8] sm:$0xf] }
  0x62   :  { %2317 = vmatmul.mubr.msk.f32.vlgmr.msra.gmra.mrb[0].mxu0 %vm186_vm0, %v3089_v20  ;;  %v161_v39 = vrot.slane %v74_v35, %v128_v22  ;;  %v165_v40 = vrot.slane %v74_v35, %v132_v37  ;;  %v173_v50 = vrot.slane %v74_v35, %v140_v43 }
  0x63   :  { %2312 = vmatmul.mubr.msk.f32.gmra.mrb[6].mxu1 %vm186_vm0, %v3094_v27  ;;  %571 = vmatprep.mubr.f32.mxu0 %v3005_v0 }
  0x64   :  { %2677 = vmatpush1.bf16.msra.mxu1 %v2676_v38  ;;  %411 = vmatprep.mubr.f32.mxu1 %v3005_v0 }
  0x65   :  { %2679 = vmatprep.subr.bf16.mxu1 %v2678_v41  ;;  %v136_v41 = vsub.s32 2, %v3137_v17 }
  0x66   :  { %2318 = vmatmul.mubr.msk.f32.gmra.mrb[2].mxu0 %vm186_vm0, %v3094_v27 }
  0x67   :  { %2313 = vmatmul.mubr.msk.f32.vlgmr.msra.gmra.mrb[8].mxu1 %vm186_vm0, %v3089_v20  ;;  %2436 = vmatprep.mubr.msk.f32.mxu0 %vm3006_vm1, %v3005_v0 }
  0x68   :  { %417 = vmatprep.mubr.f32.mxu1 %v3005_v0  ;;  %2681 = vmatpush1.bf16.msra.mxu1 %v2680_v44 }
  0x69   :  { %2683 = vmatprep.subr.bf16.mxu1 %v2682_v48  ;;  %v169_v48 = vrot.slane %v74_v35, %v136_v41 }
  0x6b   :  { %2314 = vmatmul.mubr.msk.f32.gmra.mrb[10].mxu1 %vm186_vm0, %v3094_v27 }
  0x6c   :  { %488 = vmatprep.mubr.f32.mxu1 %v3005_v0  ;;  %2685 = vmatpush1.bf16.msra.mxu1 %v2684_v53 }
  0x6d   :  { %2695 = vmatprep.subr.bf16.mxu1 %v2694_v1 }
  0x6f   :  { %2315 = vmatmul.mubr.msk.f32.vlgmr.msra.gmra.mrb[12].mxu1 %vm186_vm0, %v3089_v20 }
  0x70   :  { %494 = vmatprep.mubr.f32.mxu1 %v3005_v0  ;;  %2697 = vmatpush1.bf16.msra.mxu1 %v2696_v5 }
  0x71   :  { %2699 = vmatprep.subr.bf16.mxu1 %v2698_v8 }
  0x73   :  { %2316 = vmatmul.mubr.msk.f32.gmra.mrb[14].mxu1 %vm186_vm0, %v3094_v27 }
  0x74   :  { %642 = vmatprep.mubr.f32.mxu1 %v3005_v0  ;;  %2701 = vmatpush1.bf16.msra.mxu1 %v2700_v11 }
  0x75   :  { %2439 = vmatprep.subr.mxu1 %v3005_v0 }
  0x77   :  { %2319 = vmatmul.mubr.msk.f32.vlgmr.msra.gmra.mrb[16].mxu1 %vm186_vm0, %v3089_v20  ;;  %v144_v20 = vsub.s32 4, %v3137_v17 }
  0x78   :  { %648 = vmatprep.mubr.f32.mxu1 %v3005_v0 }
  0x79   :  { %v145_v25 = vrot.slane %v3144_v21, %v144_v20 }
  0x7b   :  { %2320 = vmatmul.mubr.msk.f32.gmra.mrb[18].mxu1 %vm186_vm0, %v3094_v27 }
  0x7c   :  { %2441 = vmatprep.mubr.msk.f32.mxu1 %vm3006_vm1, %v3005_v0 }
 0x12a   :  { %v259_v12 = vpop.f32.mrb[0].mxu1 }
 0x12b   :  { %v3133_v13 = vpop.f32.mrb[1].mxu1  ;;  %v260_v30 = vadd.f32 %v259_v12, %v129_v26 }
 0x12e   :  { %v265_v15 = vpop.f32.mrb[2].mxu1 }
 0x12f   :  { %v3135_v16 = vpop.f32.mrb[3].mxu1  ;;  %v266_v34 = vadd.f32 %v265_v15, %v129_v26 }
 0x132   :  { %v3139_v18 = vpop.f32.mrb[4].mxu1 }
 0x133   :  { %v3141_v19 = vpop.f32.mrb[5].mxu1 }
 0x135   :  { %v567_v44 = vpop.f32.mrb[0].mxu0 }
 0x136   :  { %v3147_v23 = vpop.f32.mrb[6].mxu1  ;;  %v568_v46 = vadd.f32 %v567_v44, %v161_v39  ;;  %v569_v47 = vpop.f32.mrb[1].mxu0 }
 0x137   :  { %v3149_v24 = vpop.f32.mrb[7].mxu1  ;;  %v3178_v49 = vadd.f32 %v569_v47, %v165_v40 }
 0x139   :  { %v573_v51 = vpop.f32.mrb[2].mxu0 }
 0x13a   :  { %v413_v27 = vpop.f32.mrb[8].mxu1  ;;  %v574_v53 = vadd.f32 %v573_v51, %v161_v39  ;;  %v575_v54 = vpop.f32.mrb[3].mxu0  ;;  %v133_v39 = vrot.slane %v3144_v21, %v132_v37 }
 0x13b   :  { %v414_v28 = vadd.f32 %v413_v27, %v145_v25  ;;  %v3153_v29 = vpop.f32.mrb[9].mxu1  ;;  %v3185_v57 = vadd.f32 %v575_v54, %v165_v40  ;;  %v148_v27 = vsub.s32 5, %v3137_v17 }
 0x13d   :  { %2435 = vmatpush3.xpose.msra.mxu0 %v414_v28 }
 0x13e   :  { %v419_v31 = vpop.f32.mrb[10].mxu1  ;;  %2444 = vmatprep.subr.mxu0 %v3005_v0 }
 0x13f   :  { %v420_v32 = vadd.f32 %v419_v31, %v145_v25  ;;  %v3156_v33 = vpop.f32.mrb[11].mxu1 }
 0x140   :  { %2437 = vmatmul.mubr.f32.vlgmr.msra.gmra.mrb[4].mxu0 %v260_v30 }
 0x141   :  { %2440 = vmatpush3.xpose.msra.mxu1 %v420_v32  ;;  %2446 = vmatprep.mubr.msk.f32.mxu0 %vm3006_vm1, %v3005_v0  ;;  %v149_v32 = vrot.slane %v3144_v21, %v148_v27 }
 0x142   :  { %2449 = vmatprep.subr.mxu1 %v3005_v0  ;;  %v3163_v36 = vpop.f32.mrb[12].mxu1  ;;  %2445 = vmatpush3.msra.mxu0 %v568_v46 }
 0x143   :  { %v3166_v38 = vpop.f32.mrb[13].mxu1  ;;  %2454 = vmatprep.subr.mxu0 %v3005_v0  ;;  %v416_v46 = vadd.f32 %v3153_v29, %v149_v32  ;;  %v422_v51 = vadd.f32 %v3156_v33, %v149_v32  ;;  %v268_v29 = vadd.f32 %v3135_v16, %v133_v39 }
 0x144   :  { %2442 = vmatmul.mubr.f32.vlgmr.msra.gmra.mrb[20].mxu1 %v266_v34 }
 0x145   :  { %2451 = vmatprep.mubr.msk.f32.mxu1 %vm3006_vm1, %v3005_v0  ;;  %2450 = vmatpush3.msra.mxu1 %v574_v53 }
 0x146   :  { %v3171_v42 = vpop.f32.mrb[14].mxu1  ;;  %2459 = vmatprep.subr.mxu1 %v3005_v0 }
 0x147   :  { %v3174_v45 = vpop.f32.mrb[15].mxu1 }
 0x14a   :  { %v644_v52 = vpop.f32.mrb[16].mxu1 }
 0x14b   :  { %v3183_v55 = vadd.f32 %v644_v52, %v169_v48  ;;  %v646_v56 = vpop.f32.mrb[17].mxu1 }
 0x14c   :  { %v3187_v58 = vadd.f32 %v646_v56, %v173_v50 }
 0x14e   :  { %v650_v59 = vpop.f32.mrb[18].mxu1 }
 0x14f   :  { %v3190_v60 = vadd.f32 %v650_v59, %v169_v48  ;;  %v652_v61 = vpop.f32.mrb[19].mxu1  ;;  %v262_v48 = vadd.f32 %v3133_v13, %v133_v39 }
 0x150   :  { %v3192_v62 = vadd.f32 %v652_v61, %v173_v50 }
 0x213   :  { %v721_v63 = vpop.f32.mrb[4].mxu0 }
 0x214   :  { %v2438_v1 = vpop.f32.mrb[5].mxu0  ;;  %v796_v2 = vsel %vm795_vm2, %v721_v63, -inf }
 0x215   :  { %797 = vmax.xlane.f32.xlu0 %v796_v2 }
 0x217   :  { %v791_v3 = vpop.f32.mrb[20].mxu1 }
 0x218   :  { %v2443_v4 = vpop.f32.mrb[21].mxu1  ;;  %v799_v5 = vsel %vm795_vm2, %v791_v3, -inf }
 0x219   :  { %800 = vmax.xlane.f32.xlu0 %v799_v5 }
 0x2a2   :  { %v798_v6 = vpop.xlane.xlu0 %797 }
 0x2a3   :  { %v802_v7 = vsub.f32 %v721_v63, %v798_v6 }
 0x2a5   :  { %v804_v8 = vmul.f32 1.442695, %v802_v7 }
 0x2a6   :  { %v801_v9 = vpop.xlane.xlu0 %800 }
 0x2a7   :  { %2847 = vpow2.f32 %v804_v8  ;;  %v803_v10 = vsub.f32 %v791_v3, %v801_v9  ;;  %v970_v8 = vld [vmem:[#allocation7] sm:$0xff]  ;;  %v971_v9 = vld [vmem:[#allocation7 + $0x8] sm:$0xff] }
 0x2a9   :  { %v806_v11 = vmul.f32 1.442695, %v803_v10  ;;  %v2734_v10 = vpack.c.bf16 %v971_v9, %v970_v8  ;;  %v983_v8 = vld [vmem:[#allocation7 + $0x68] sm:$0xff]  ;;  %v1310_v9 = vld [vmem:[#allocation7 + $0xd0] sm:$0xff] }
 0x2ab   :  { %2849 = vpow2.f32 %v806_v11  ;;  %v1300_v11 = vld [vmem:[#allocation7 + $0x80] sm:$0xff] }
 0x2b1   :  { %v2848_v12 = vpop.eup %2847 }
 0x2b2   :  { %v808_v14 = vsel %vm795_vm2, %v2848_v12, 0.0 }
 0x2b3   :  { %809 = vadd.xlane.f32.xlu1 %v808_v14 }
 0x2b5   :  { %v2850_v15 = vpop.eup %2849 }
 0x2b6   :  { %v811_v20 = vsel %vm795_vm2, %v2850_v15, 0.0 }
 0x2b7   :  { %812 = vadd.xlane.f32.xlu1 %v811_v20 }
 0x340   :  { %v810_v22 = vpop.xlane.xlu1 %809 }
 0x341   :  { %2851 = vrcp.f32 %v810_v22 }
 0x344   :  { %v813_v25 = vpop.xlane.xlu1 %812 }
 0x345   :  { %2853 = vrcp.f32 %v813_v25 }
 0x34b   :  { %v2852_v26 = vpop.eup %2851 }
 0x34c   :  { %v816_v28 = vmul.f32 %v2852_v26, %v810_v22 }
 0x34e   :  { %v818_v30 = vsub.f32 2.0, %v816_v28  ;;  %v972_v28 = vld [vmem:[#allocation7 + $0x10] sm:$0xff] }
 0x34f   :  { %v2854_v31 = vpop.eup %2853 }
 0x350   :  { %v820_v34 = vmul.f32 %v2852_v26, %v818_v30  ;;  %v817_v35 = vmul.f32 %v2854_v31, %v813_v25  ;;  %v973_v30 = vld [vmem:[#allocation7 + $0x18] sm:$0xff] }
 0x351   :  { %v2738_v39 = vpack.c.bf16 %v973_v30, %v972_v28  ;;  %v1315_v28 = vld [vmem:[#allocation7 + $0xf8] sm:$0xff] }
 0x352   :  { %v822_v40 = vmul.f32 %v2848_v12, %v820_v34  ;;  %v819_v44 = vsub.f32 2.0, %v817_v35  ;;  %v1301_v12 = vld [vmem:[#allocation7 + $0x88] sm:$0xff] }
 0x353   :  { %v2702_v14 = vpack.c.bf16 %v1301_v12, %v1300_v11  ;;  %v984_v12 = vld [vmem:[#allocation7 + $0x70] sm:$0xff] }
 0x354   :  { %v821_v47 = vmul.f32 %v2854_v31, %v819_v44  ;;  %2447 = vmatmul.mubr.msk.f32.vlgmr.msra.gmra.mrb[6].mxu0 %vm795_vm2, %v822_v40  ;;  %v974_v40 = vld [vmem:[#allocation7 + $0x20] sm:$0xff]  ;;  %v975_v44 = vld [vmem:[#allocation7 + $0x28] sm:$0xff] }
 0x355   :  { %2455 = vmatpush3.xpose.msra.mxu0 %v416_v46  ;;  %2456 = vmatprep.mubr.msk.f32.mxu0 %vm3006_vm1, %v3005_v0  ;;  %v1302_v46 = vld [vmem:[#allocation7 + $0x90] sm:$0xff] }
 0x356   :  { %v823_v50 = vmul.f32 %v2850_v15, %v821_v47  ;;  %2464 = vmatprep.subr.mxu0 %v3005_v0  ;;  %v1303_v47 = vld [vmem:[#allocation7 + $0x98] sm:$0xff] }
 0x358   :  { %2452 = vmatmul.mubr.msk.f32.vlgmr.msra.gmra.mrb[22].mxu1 %vm795_vm2, %v823_v50  ;;  %2457 = vmatmul.mubr.f32.vlgmr.msra.gmra.mrb[8].mxu0 %v262_v48 }
 0x359   :  { %2460 = vmatpush3.xpose.msra.mxu1 %v422_v51  ;;  %2465 = vmatpush3.msra.mxu0 %v3178_v49  ;;  %v2742_v51 = vpack.c.bf16 %v975_v44, %v974_v40 }
 0x35a   :  { %2461 = vmatprep.mubr.msk.f32.mxu1 %vm3006_vm1, %v3005_v0  ;;  %2469 = vmatprep.subr.mxu1 %v3005_v0 }
 0x35b   :  { %2466 = vmatprep.mubr.msk.f32.mxu0 %vm3006_vm1, %v3005_v0  ;;  %2735 = vmatprep.subr.bf16.mxu0 %v2734_v10 }
 0x35c   :  { %2462 = vmatmul.mubr.f32.vlgmr.msra.gmra.mrb[24].mxu1 %v268_v29  ;;  %v976_v29 = vld [vmem:[#allocation7 + $0x30] sm:$0xff] }
 0x35d   :  { %2470 = vmatpush3.msra.mxu1 %v3185_v57  ;;  %2471 = vmatprep.mubr.msk.f32.mxu1 %vm3006_vm1, %v3005_v0 }
 0x35e   :  { %2703 = vmatprep.subr.bf16.mxu1 %v2702_v14 }
 0x427   :  { %v893_v13 = vpop.f32.mrb[6].mxu0 }
 0x428   :  { %v2448_v33 = vpop.f32.mrb[7].mxu0 }
 0x429   :  { %v2706_v33 = vpack.c.bf16 %v1303_v47, %v1302_v46 }
 0x42b   :  { %v3221_v37 = vpop.f32.mrb[22].mxu1  ;;  %v1052_v49 = vpop.f32.mrb[8].mxu0 }
 0x42c   :  { %v2453_v16 = vpop.f32.mrb[23].mxu1  ;;  %v2458_v52 = vpop.f32.mrb[9].mxu0  ;;  %v1126_v53 = vsel %vm795_vm2, %v1052_v49, -inf }
 0x42d   :  { %1127 = vmax.xlane.f32.xlu0 %v1126_v53  ;;  %v1304_v16 = vld [vmem:[#allocation7 + $0xa0] sm:$0xff]  ;;  %v1305_v52 = vld [vmem:[#allocation7 + $0xa8] sm:$0xff] }
 0x42f   :  { %v1122_v54 = vpop.f32.mrb[24].mxu1 }
 0x430   :  { %v2463_v56 = vpop.f32.mrb[25].mxu1  ;;  %v1129_v59 = vsel %vm795_vm2, %v1122_v54, -inf }
 0x431   :  { %1130 = vmax.xlane.f32.xlu1 %v1129_v59  ;;  %v2710_v56 = vpack.c.bf16 %v1305_v52, %v1304_v16  ;;  %v979_v59 = vld [vmem:[#allocation7 + $0x48] sm:$0xff] }
 0x4ba   :  { %v1128_v61 = vpop.xlane.xlu0 %1127 }
 0x4bb   :  { %v1132_v57 = vsub.f32 %v1052_v49, %v1128_v61  ;;  %v977_v49 = vld [vmem:[#allocation7 + $0x38] sm:$0xff]  ;;  %v1306_v61 = vld [vmem:[#allocation7 + $0xb0] sm:$0xff] }
 0x4bc   :  { %v2746_v53 = vpack.c.bf16 %v977_v49, %v976_v29 }
 0x4bd   :  { %v1134_v63 = vmul.f32 1.442695, %v1132_v57 }
 0x4be   :  { %v1131_v1 = vpop.xlane.xlu1 %1130 }
 0x4bf   :  { %2855 = vpow2.f32 %v1134_v63  ;;  %v1133_v2 = vsub.f32 %v1122_v54, %v1131_v1  ;;  %v978_v54 = vld [vmem:[#allocation7 + $0x40] sm:$0xff]  ;;  %v980_v63 = vld [vmem:[#allocation7 + $0x50] sm:$0xff] }
 0x4c0   :  { %v2750_v57 = vpack.c.bf16 %v979_v59, %v978_v54 }
 0x4c1   :  { %v1136_v3 = vmul.f32 1.442695, %v1133_v2  ;;  %v981_v2 = vld [vmem:[#allocation7 + $0x58] sm:$0xff] }
 0x4c3   :  { %2857 = vpow2.f32 %v1136_v3  ;;  %v1308_v3 = vld [vmem:[#allocation7 + $0xc0] sm:$0xff] }
 0x4c9   :  { %v2856_v4 = vpop.eup %2855 }
 0x4ca   :  { %v1138_v5 = vsel %vm795_vm2, %v2856_v4, 0.0 }
 0x4cb   :  { %1139 = vadd.xlane.f32.xlu0 %v1138_v5  ;;  %v2754_v5 = vpack.c.bf16 %v981_v2, %v980_v63  ;;  %v1782_v63 = vld [vmem:[#allocation7 + $0x110] sm:$0xff]  ;;  %v1783_v2 = vld [vmem:[#allocation7 + $0x118] sm:$0xff] }
 0x4cd   :  { %v2858_v6 = vpop.eup %2857 }
 0x4ce   :  { %v1141_v7 = vsel %vm795_vm2, %v2858_v6, 0.0 }
 0x4cf   :  { %1142 = vadd.xlane.f32.xlu1 %v1141_v7 }
 0x558   :  { %v1140_v15 = vpop.xlane.xlu0 %1139 }
 0x559   :  { %2859 = vrcp.f32 %v1140_v15 }
 0x55c   :  { %v1143_v20 = vpop.xlane.xlu1 %1142 }
 0x55d   :  { %2861 = vrcp.f32 %v1143_v20 }
 0x563   :  { %v2860_v22 = vpop.eup %2859 }
 0x564   :  { %v1146_v25 = vmul.f32 %v2860_v22, %v1140_v15  ;;  %v985_v15 = vld [vmem:[#allocation7 + $0x78] sm:$0xff] }
 0x566   :  { %v1148_v26 = vsub.f32 2.0, %v1146_v25  ;;  %v2762_v25 = vpack.c.bf16 %v985_v15, %v984_v12  ;;  %v1791_v15 = vld [vmem:[#allocation7 + $0x158] sm:$0xff] }
 0x567   :  { %v2862_v27 = vpop.eup %2861 }
 0x568   :  { %v1150_v31 = vmul.f32 %v2860_v22, %v1148_v26  ;;  %v1147_v32 = vmul.f32 %v2862_v27, %v1143_v20  ;;  %v1312_v20 = vld [vmem:[#allocation7 + $0xe0] sm:$0xff]  ;;  %v1313_v22 = vld [vmem:[#allocation7 + $0xe8] sm:$0xff] }
 0x569   :  { %v2726_v26 = vpack.c.bf16 %v1313_v22, %v1312_v20  ;;  %v1792_v22 = vld [vmem:[#allocation7 + $0x160] sm:$0xff] }
 0x56a   :  { %v1152_v34 = vmul.f32 %v2856_v4, %v1150_v31  ;;  %v1149_v35 = vsub.f32 2.0, %v1147_v32  ;;  %v1309_v4 = vld [vmem:[#allocation7 + $0xc8] sm:$0xff]  ;;  %v152_v31 = vsub.s32 6, %v3137_v17 }
 0x56b   :  { %v2718_v7 = vpack.c.bf16 %v1309_v4, %v1308_v3  ;;  %v2770_v3 = vpack.c.bf16 %v1783_v2, %v1782_v63  ;;  %v1784_v4 = vld [vmem:[#allocation7 + $0x120] sm:$0xff]  ;;  %v2188_v2 = vld [vmem:[#allocation7 + $0x188] sm:$0xff] }
 0x56c   :  { %v1151_v48 = vmul.f32 %v2862_v27, %v1149_v35  ;;  %2467 = vmatmul.mubr.msk.f32.vlgmr.msra.gmra.mrb[10].mxu0 %vm795_vm2, %v1152_v34  ;;  %v1314_v27 = vld [vmem:[#allocation7 + $0xf0] sm:$0xff]  ;;  %v153_v32 = vrot.slane %v3144_v21, %v152_v31 }
 0x56d   :  { %2737 = vmatpush3.bf16.msra.mxu0 %v2734_v10  ;;  %2541 = vmatprep.mubr.f32.mxu0 %v893_v13  ;;  %v1307_v13 = vld [vmem:[#allocation7 + $0xb8] sm:$0xff]  ;;  %v2730_v30 = vpack.c.bf16 %v1315_v28, %v1314_v27 }
 0x56e   :  { %v1153_v50 = vmul.f32 %v2858_v6, %v1151_v48  ;;  %2739 = vmatprep.subr.bf16.mxu0 %v2738_v39  ;;  %v2714_v1 = vpack.c.bf16 %v1307_v13, %v1306_v61  ;;  %v982_v6 = vld [vmem:[#allocation7 + $0x60] sm:$0xff]  ;;  %v1311_v10 = vld [vmem:[#allocation7 + $0xd8] sm:$0xff]  ;;  %v491_v40 = vadd.f32 %v3163_v36, %v153_v32  ;;  %v497_v47 = vadd.f32 %v3171_v42, %v153_v32 }
 0x56f   :  { %v2758_v11 = vpack.c.bf16 %v983_v8, %v982_v6  ;;  %v1780_v13 = vld [vmem:[#allocation7 + $0x100] sm:$0xff]  ;;  %v1787_v8 = vld [vmem:[#allocation7 + $0x138] sm:$0xff] }
 0x570   :  { %2472 = vmatmul.mubr.msk.f32.vlgmr.msra.gmra.mrb[26].mxu1 %vm795_vm2, %v1153_v50 }
 0x571   :  { %2741 = vmatpush3.bf16.msra.mxu0 %v2738_v39  ;;  %2705 = vmatpush3.bf16.msra.mxu1 %v2702_v14  ;;  %v2722_v14 = vpack.c.bf16 %v1311_v10, %v1310_v9  ;;  %v137_v39 = vrot.slane %v3144_v21, %v136_v41  ;;  %v1788_v10 = vld [vmem:[#allocation7 + $0x140] sm:$0xff] }
 0x572   :  { %2743 = vmatprep.subr.bf16.mxu0 %v2742_v51  ;;  %2707 = vmatprep.subr.bf16.mxu1 %v2706_v33 }
 0x573   :  { %v343_v36 = vadd.f32 %v3147_v23, %v137_v39 }
 0x575   :  { %2745 = vmatpush3.bf16.msra.mxu0 %v2742_v51  ;;  %2709 = vmatpush3.bf16.msra.mxu1 %v2706_v33 }
 0x576   :  { %2747 = vmatprep.subr.bf16.mxu0 %v2746_v53  ;;  %2711 = vmatprep.subr.bf16.mxu1 %v2710_v56 }
 0x579   :  { %2749 = vmatpush3.bf16.msra.mxu0 %v2746_v53  ;;  %2713 = vmatpush3.bf16.msra.mxu1 %v2710_v56 }
 0x57a   :  { %2751 = vmatprep.subr.bf16.mxu0 %v2750_v57  ;;  %2715 = vmatprep.subr.bf16.mxu1 %v2714_v1 }
 0x57d   :  { %2753 = vmatpush3.bf16.msra.mxu0 %v2750_v57  ;;  %2717 = vmatpush3.bf16.msra.mxu1 %v2714_v1  ;;  %v1781_v57 = vld [vmem:[#allocation7 + $0x108] sm:$0xff] }
 0x57e   :  { %2755 = vmatprep.subr.bf16.mxu0 %v2754_v5  ;;  %2719 = vmatprep.subr.bf16.mxu1 %v2718_v7  ;;  %v2766_v1 = vpack.c.bf16 %v1781_v57, %v1780_v13 }
 0x581   :  { %2757 = vmatpush3.bf16.msra.mxu0 %v2754_v5  ;;  %2721 = vmatpush3.bf16.msra.mxu1 %v2718_v7  ;;  %v1785_v5 = vld [vmem:[#allocation7 + $0x128] sm:$0xff]  ;;  %v1786_v7 = vld [vmem:[#allocation7 + $0x130] sm:$0xff] }
 0x582   :  { %2759 = vmatprep.subr.bf16.mxu0 %v2758_v11  ;;  %2723 = vmatprep.subr.bf16.mxu1 %v2722_v14  ;;  %v2774_v6 = vpack.c.bf16 %v1785_v5, %v1784_v4  ;;  %v2778_v9 = vpack.c.bf16 %v1787_v8, %v1786_v7  ;;  %v2190_v5 = vld [vmem:[#allocation7 + $0x198] sm:$0xff]  ;;  %v2191_v7 = vld [vmem:[#allocation7 + $0x1a0] sm:$0xff]  ;;  %v2192_v8 = vld [vmem:[#allocation7 + $0x1a8] sm:$0xff] }
 0x585   :  { %2761 = vmatpush3.bf16.msra.mxu0 %v2758_v11  ;;  %2725 = vmatpush3.bf16.msra.mxu1 %v2722_v14  ;;  %v1789_v11 = vld [vmem:[#allocation7 + $0x148] sm:$0xff]  ;;  %v1790_v14 = vld [vmem:[#allocation7 + $0x150] sm:$0xff] }
 0x586   :  { %2763 = vmatprep.subr.bf16.mxu0 %v2762_v25  ;;  %2727 = vmatprep.subr.bf16.mxu1 %v2726_v26  ;;  %v2782_v12 = vpack.c.bf16 %v1789_v11, %v1788_v10  ;;  %v2786_v20 = vpack.c.bf16 %v1791_v15, %v1790_v14  ;;  %v2193_v10 = vld [vmem:[#allocation7 + $0x1b0] sm:$0xff]  ;;  %v2194_v11 = vld [vmem:[#allocation7 + $0x1b8] sm:$0xff]  ;;  %v2195_v14 = vld [vmem:[#allocation7 + $0x1c0] sm:$0xff] }
 0x587   :  { %v2196_v15 = vld [vmem:[#allocation7 + $0x1c8] sm:$0xff] }
 0x589   :  { %2765 = vmatpush3.bf16.msra.mxu0 %v2762_v25  ;;  %2729 = vmatpush3.bf16.msra.mxu1 %v2726_v26  ;;  %v1793_v25 = vld [vmem:[#allocation7 + $0x168] sm:$0xff] }
 0x58a   :  { %2731 = vmatprep.subr.bf16.mxu1 %v2730_v30  ;;  %2767 = vmatprep.subr.bf16.mxu0 %v2766_v1  ;;  %v2790_v26 = vpack.c.bf16 %v1793_v25, %v1792_v22  ;;  %v2197_v22 = vld [vmem:[#allocation7 + $0x1d0] sm:$0xff]  ;;  %v2198_v25 = vld [vmem:[#allocation7 + $0x1d8] sm:$0xff] }
 0x58c   :  { %2542 = vmatmul.mubr.f32.vlgmr.msra.gmra.mrb[12].mxu0 %v3221_v37  ;;  %v337_v37 = vadd.f32 %v3139_v18, %v137_v39 }
 0x58d   :  { %2733 = vmatpush3.bf16.msra.mxu1 %v2730_v30  ;;  %2769 = vmatpush3.bf16.msra.mxu0 %v2766_v1  ;;  %v2187_v1 = vld [vmem:[#allocation7 + $0x180] sm:$0xff] }
 0x58e   :  { %2544 = vmatprep.subr.mxu1 %v3005_v0  ;;  %2771 = vmatprep.subr.bf16.mxu0 %v2770_v3  ;;  %v2798_v4 = vpack.c.bf16 %v2188_v2, %v2187_v1 }
 0x591   :  { %2773 = vmatpush3.bf16.msra.mxu0 %v2770_v3  ;;  %v2189_v3 = vld [vmem:[#allocation7 + $0x190] sm:$0xff] }
 0x592   :  { %2775 = vmatprep.subr.bf16.mxu0 %v2774_v6 }
 0x595   :  { %2777 = vmatpush3.bf16.msra.mxu0 %v2774_v6  ;;  %v2802_v6 = vpack.c.bf16 %v2190_v5, %v2189_v3 }
 0x596   :  { %2779 = vmatprep.subr.bf16.mxu0 %v2778_v9 }
 0x599   :  { %2781 = vmatpush3.bf16.msra.mxu0 %v2778_v9  ;;  %v2806_v9 = vpack.c.bf16 %v2192_v8, %v2191_v7 }
 0x59a   :  { %2783 = vmatprep.subr.bf16.mxu0 %v2782_v12 }
 0x59d   :  { %2785 = vmatpush3.bf16.msra.mxu0 %v2782_v12  ;;  %v2810_v12 = vpack.c.bf16 %v2194_v11, %v2193_v10 }
 0x59e   :  { %2787 = vmatprep.subr.bf16.mxu0 %v2786_v20 }
 0x5a1   :  { %2789 = vmatpush3.bf16.msra.mxu0 %v2786_v20  ;;  %v2814_v20 = vpack.c.bf16 %v2196_v15, %v2195_v14 }
 0x5a2   :  { %2791 = vmatprep.subr.bf16.mxu0 %v2790_v26 }
 0x5a5   :  { %2793 = vmatpush3.bf16.msra.mxu0 %v2790_v26  ;;  %v2818_v26 = vpack.c.bf16 %v2198_v25, %v2197_v22 }
 0x63f   :  { %v1223_v34 = vpop.f32.mrb[10].mxu0 }
 0x640   :  { %v2468_v35 = vpop.f32.mrb[11].mxu0  ;;  %2506 = vmatprep.mubr.f32.mxu1 %v1223_v34 }
 0x643   :  { %v1296_v44 = vpop.f32.mrb[26].mxu1 }
 0x644   :  { %v2473_v46 = vpop.f32.mrb[27].mxu1  ;;  %2507 = vmatmul.mubr.f32.vlgmr.msra.gmra.mrb[28].mxu1 %v1296_v44 }
 0x645   :  { %2545 = vmatpush3.xpose.msra.mxu1 %v491_v40  ;;  %2546 = vmatprep.mubr.msk.f32.mxu1 %vm3006_vm1, %v3005_v0  ;;  %v156_v40 = vsub.s32 7, %v3137_v17 }
 0x646   :  { %2549 = vmatprep.subr.mxu1 %v3005_v0 }
 0x648   :  { %2547 = vmatmul.mubr.f32.vlgmr.msra.gmra.mrb[30].mxu1 %v337_v37 }
 0x649   :  { %2550 = vmatpush3.xpose.msra.mxu1 %v497_v47  ;;  %2551 = vmatprep.mubr.msk.f32.mxu1 %vm3006_vm1, %v3005_v0  ;;  %v157_v47 = vrot.slane %v3144_v21, %v156_v40 }
 0x64a   :  { %2554 = vmatprep.subr.mxu1 %v3005_v0 }
 0x64c   :  { %2552 = vmatmul.mubr.f32.vlgmr.msra.gmra.mrb[32].mxu1 %v343_v36 }
 0x64d   :  { %2555 = vmatpush3.msra.mxu1 %v3183_v55  ;;  %2556 = vmatprep.mubr.msk.f32.mxu1 %vm3006_vm1, %v3005_v0 }
 0x64e   :  { %2559 = vmatprep.subr.mxu1 %v3005_v0 }
 0x717   :  { %v3250_v18 = vpop.f32.mrb[28].mxu1 }
 0x718   :  { %v3252_v41 = vpop.f32.mrb[29].mxu1 }
 0x71b   :  { %v1532_v42 = vpop.f32.mrb[30].mxu1 }
 0x71c   :  { %v2548_v48 = vpop.f32.mrb[31].mxu1  ;;  %v1606_v50 = vsel %vm795_vm2, %v1532_v42, -inf }
 0x71d   :  { %1607 = vmax.xlane.f32.xlu0 %v1606_v50  ;;  %v493_v48 = vadd.f32 %v3166_v38, %v157_v47  ;;  %v499_v50 = vadd.f32 %v3174_v45, %v157_v47 }
 0x71f   :  { %v1602_v23 = vpop.f32.mrb[32].mxu1 }
 0x720   :  { %v2553_v51 = vpop.f32.mrb[33].mxu1  ;;  %v1609_v29 = vsel %vm795_vm2, %v1602_v23, -inf }
 0x721   :  { %1610 = vmax.xlane.f32.xlu1 %v1609_v29 }
 0x7aa   :  { %v1608_v55 = vpop.xlane.xlu0 %1607 }
 0x7ab   :  { %v1612_v33 = vsub.f32 %v1532_v42, %v1608_v55  ;;  %v141_v42 = vrot.slane %v3144_v21, %v140_v43  ;;  %v1795_v21 = vld [vmem:[#allocation7 + $0x178] sm:$0xff] }
 0x7ad   :  { %v1614_v49 = vmul.f32 1.442695, %v1612_v33  ;;  %v345_v17 = vadd.f32 %v3149_v24, %v141_v42 }
 0x7ae   :  { %v1611_v16 = vpop.xlane.xlu1 %1610 }
 0x7af   :  { %2863 = vpow2.f32 %v1614_v49  ;;  %v1613_v52 = vsub.f32 %v1602_v23, %v1611_v16 }
 0x7b1   :  { %v1616_v53 = vmul.f32 1.442695, %v1613_v52 }
 0x7b3   :  { %2865 = vpow2.f32 %v1616_v53 }
 0x7b9   :  { %v2864_v54 = vpop.eup %2863 }
 0x7ba   :  { %v1618_v56 = vsel %vm795_vm2, %v2864_v54, 0.0 }
 0x7bb   :  { %1619 = vadd.xlane.f32.xlu0 %v1618_v56 }
 0x7bd   :  { %v2866_v59 = vpop.eup %2865 }
 0x7be   :  { %v1621_v61 = vsel %vm795_vm2, %v2866_v59, 0.0 }
 0x7bf   :  { %1622 = vadd.xlane.f32.xlu1 %v1621_v61 }
 0x848   :  { %v1620_v27 = vpop.xlane.xlu0 %1619 }
 0x849   :  { %2867 = vrcp.f32 %v1620_v27 }
 0x84c   :  { %v1623_v28 = vpop.xlane.xlu1 %1622 }
 0x84d   :  { %2869 = vrcp.f32 %v1623_v28 }
 0x853   :  { %v2868_v30 = vpop.eup %2867 }
 0x854   :  { %v1626_v31 = vmul.f32 %v2868_v30, %v1620_v27  ;;  %v2199_v27 = vld [vmem:[#allocation7 + $0x1e0] sm:$0xff] }
 0x856   :  { %v1628_v32 = vsub.f32 2.0, %v1626_v31 }
 0x857   :  { %v2870_v34 = vpop.eup %2869 }
 0x858   :  { %v1630_v35 = vmul.f32 %v2868_v30, %v1628_v32  ;;  %v1627_v39 = vmul.f32 %v2870_v34, %v1623_v28  ;;  %v2200_v28 = vld [vmem:[#allocation7 + $0x1e8] sm:$0xff] }
 0x859   :  { %v2822_v30 = vpack.c.bf16 %v2200_v28, %v2199_v27 }
 0x85a   :  { %v1632_v44 = vmul.f32 %v2864_v54, %v1630_v35  ;;  %v1629_v46 = vsub.f32 2.0, %v1627_v39 }
 0x85c   :  { %v1631_v37 = vmul.f32 %v2870_v34, %v1629_v46  ;;  %2557 = vmatmul.mubr.msk.f32.vlgmr.msra.gmra.mrb[34].mxu1 %vm795_vm2, %v1632_v44 }
 0x85d   :  { %2560 = vmatpush3.msra.mxu1 %v3190_v60  ;;  %2561 = vmatprep.mubr.msk.f32.mxu1 %vm3006_vm1, %v3005_v0  ;;  %v339_v60 = vadd.f32 %v3141_v19, %v141_v42  ;;  %v1794_v19 = vld [vmem:[#allocation7 + $0x170] sm:$0xff] }
 0x85e   :  { %v1633_v36 = vmul.f32 %v2866_v59, %v1631_v37  ;;  %2599 = vmatprep.subr.mxu1 %v3005_v0  ;;  %v2794_v38 = vpack.c.bf16 %v1795_v21, %v1794_v19 }
 0x860   :  { %2562 = vmatmul.mubr.msk.f32.vlgmr.msra.gmra.mrb[36].mxu1 %vm795_vm2, %v1633_v36  ;;  %2795 = vmatprep.subr.bf16.mxu0 %v2794_v38 }
 0x861   :  { %2601 = vmatprep.mubr.msk.f32.mxu1 %vm3006_vm1, %v3005_v0  ;;  %2797 = vmatpush3.bf16.msra.mxu0 %v2794_v38 }
 0x862   :  { %2799 = vmatprep.subr.bf16.mxu0 %v2798_v4 }
 0x864   :  { %2600 = vmatpush3.xpose.msra.mxu1 %v493_v48  ;;  %v2201_v48 = vld [vmem:[#allocation7 + $0x1f0] sm:$0xff] }
 0x865   :  { %2604 = vmatprep.subr.mxu1 %v3005_v0 }
 0x867   :  { %2602 = vmatmul.mubr.f32.vlgmr.msra.gmra.mrb[38].mxu1 %v339_v60  ;;  %v2202_v60 = vld [vmem:[#allocation7 + $0x1f8] sm:$0xff] }
 0x868   :  { %2605 = vmatpush3.xpose.msra.mxu1 %v499_v50  ;;  %2606 = vmatprep.mubr.msk.f32.mxu1 %vm3006_vm1, %v3005_v0  ;;  %v2826_v50 = vpack.c.bf16 %v2202_v60, %v2201_v48 }
 0x869   :  { %2609 = vmatprep.subr.mxu1 %v3005_v0 }
 0x86b   :  { %2607 = vmatmul.mubr.f32.vlgmr.msra.gmra.mrb[40].mxu1 %v345_v17 }
 0x86c   :  { %2610 = vmatpush3.msra.mxu1 %v3187_v58  ;;  %2611 = vmatprep.mubr.msk.f32.mxu1 %vm3006_vm1, %v3005_v0 }
 0x86d   :  { %2614 = vmatprep.subr.mxu1 %v3005_v0 }
 0x92f   :  { %v1703_v43 = vpop.f32.mrb[34].mxu1 }
 0x930   :  { %v2558_v45 = vpop.f32.mrb[35].mxu1  ;;  %2596 = vmatprep.mubr.f32.mxu0 %v1703_v43  ;;  %v2329_v43 = vld [vmem:[#allocation8 + $0xc] ss:$0 sm:$0xff] }
 0x933   :  { %v1776_v23 = vpop.f32.mrb[36].mxu1 }
 0x934   :  { %v2563_v24 = vpop.f32.mrb[37].mxu1  ;;  %2597 = vmatmul.mubr.f32.vlgmr.msra.gmra.mrb[12].mxu0 %v1776_v23 }
 0x935   :  { %2801 = vmatpush3.bf16.msra.mxu0 %v2798_v4 }
 0x936   :  { %2803 = vmatprep.subr.bf16.mxu0 %v2802_v6 }
 0x939   :  { %2805 = vmatpush3.bf16.msra.mxu0 %v2802_v6 }
 0x93a   :  { %v1939_v51 = vpop.f32.mrb[38].mxu1  ;;  %2807 = vmatprep.subr.bf16.mxu0 %v2806_v9 }
 0x93b   :  { %v2603_v29 = vpop.f32.mrb[39].mxu1  ;;  %v2013_v58 = vsel %vm795_vm2, %v1939_v51, -inf }
 0x93c   :  { %2014 = vmax.xlane.f32.xlu0 %v2013_v58 }
 0x93d   :  { %2809 = vmatpush3.bf16.msra.mxu0 %v2806_v9 }
 0x93e   :  { %v2009_v55 = vpop.f32.mrb[40].mxu1  ;;  %2811 = vmatprep.subr.bf16.mxu0 %v2810_v12 }
 0x93f   :  { %v2608_v33 = vpop.f32.mrb[41].mxu1  ;;  %v2016_v49 = vsel %vm795_vm2, %v2009_v55, -inf }
 0x940   :  { %2017 = vmax.xlane.f32.xlu1 %v2016_v49 }
 0x941   :  { %2813 = vmatpush3.bf16.msra.mxu0 %v2810_v12 }
 0x942   :  { %2815 = vmatprep.subr.bf16.mxu0 %v2814_v20 }
 0x945   :  { %2817 = vmatpush3.bf16.msra.mxu0 %v2814_v20 }
 0x946   :  { %2819 = vmatprep.subr.bf16.mxu0 %v2818_v26 }
 0x949   :  { %2821 = vmatpush3.bf16.msra.mxu0 %v2818_v26 }
 0x94a   :  { %2823 = vmatprep.subr.bf16.mxu0 %v2822_v30 }
 0x94d   :  { %2825 = vmatpush3.bf16.msra.mxu0 %v2822_v30 }
 0x94e   :  { %2827 = vmatprep.subr.bf16.mxu0 %v2826_v50 }
 0x951   :  { %2829 = vmatpush3.bf16.msra.mxu0 %v2826_v50 }
 0x9c9   :  { %v2015_v16 = vpop.xlane.xlu0 %2014 }
 0x9ca   :  { %v2019_v52 = vsub.f32 %v1939_v51, %v2015_v16 }
 0x9cc   :  { %v2021_v53 = vmul.f32 1.442695, %v2019_v52 }
 0x9cd   :  { %v2018_v54 = vpop.xlane.xlu1 %2017 }
 0x9ce   :  { %2871 = vpow2.f32 %v2021_v53  ;;  %v2020_v56 = vsub.f32 %v2009_v55, %v2018_v54 }
 0x9d0   :  { %v2023_v59 = vmul.f32 1.442695, %v2020_v56 }
 0x9d2   :  { %2873 = vpow2.f32 %v2023_v59 }
 0x9d8   :  { %v2872_v61 = vpop.eup %2871 }
 0x9d9   :  { %v2025_v13 = vsel %vm795_vm2, %v2872_v61, 0.0 }
 0x9da   :  { %2026 = vadd.xlane.f32.xlu0 %v2025_v13 }
 0x9dc   :  { %v2874_v57 = vpop.eup %2873 }
 0x9dd   :  { %v2028_v63 = vsel %vm795_vm2, %v2874_v57, 0.0 }
 0x9de   :  { %2029 = vadd.xlane.f32.xlu1 %v2028_v63 }
 0xa67   :  { %v2027_v31 = vpop.xlane.xlu0 %2026 }
 0xa68   :  { %2875 = vrcp.f32 %v2027_v31 }
 0xa6b   :  { %v2030_v32 = vpop.xlane.xlu1 %2029 }
 0xa6c   :  { %2877 = vrcp.f32 %v2030_v32 }
 0xa72   :  { %v2876_v34 = vpop.eup %2875 }
 0xa73   :  { %v2033_v35 = vmul.f32 %v2876_v34, %v2027_v31 }
 0xa75   :  { %v2035_v39 = vsub.f32 2.0, %v2033_v35 }
 0xa76   :  { %v2878_v40 = vpop.eup %2877 }
 0xa77   :  { %v2037_v44 = vmul.f32 %v2876_v34, %v2035_v39  ;;  %v2034_v46 = vmul.f32 %v2878_v40, %v2030_v32 }
 0xa79   :  { %v2039_v37 = vmul.f32 %v2872_v61, %v2037_v44  ;;  %v2036_v47 = vsub.f32 2.0, %v2034_v46 }
 0xa7b   :  { %v2038_v36 = vmul.f32 %v2878_v40, %v2036_v47  ;;  %2612 = vmatmul.mubr.msk.f32.vlgmr.msra.gmra.mrb[42].mxu1 %vm795_vm2, %v2039_v37 }
 0xa7c   :  { %2615 = vmatpush3.msra.mxu1 %v3192_v62  ;;  %2616 = vmatprep.mubr.msk.f32.mxu1 %vm3006_vm1, %v3005_v0 }
 0xa7d   :  { %v2040_v42 = vmul.f32 %v2874_v57, %v2038_v36 }
 0xa7f   :  { %2617 = vmatmul.mubr.msk.f32.vlgmr.msra.gmra.mrb[44].mxu1 %vm795_vm2, %v2040_v42 }
 0xb4e   :  { %v2110_v17 = vpop.f32.mrb[42].mxu1 }
 0xb4f   :  { %v2613_v19 = vpop.f32.mrb[43].mxu1  ;;  %2651 = vmatprep.mubr.f32.mxu0 %v2110_v17 }
 0xb52   :  { %v2183_v21 = vpop.f32.mrb[44].mxu1 }
 0xb53   :  { %v2618_v38 = vpop.f32.mrb[45].mxu1  ;;  %2652 = vmatmul.mubr.f32.vlgmr.msra.gmra.mrb[12].mxu0 %v2183_v21 }
 0xc26   :  { %v2653_v45 = vpop.f32.mrb[12].mxu0 }
 0xc27   :  { %v2830_v62 = vadd.f32 %v2653_v45, %v3250_v18  ;;  %v2269_v23 = vpop.f32.mrb[13].mxu0 }
 0xc28   :  { %v2831_v0 = vadd.f32 %v2269_v23, %v3252_v41 }
 0xc29   :  { %v2287_v24 = vadd.f32 %v2830_v62, %v2329_v43 }
 0xc2a   :  { %v2286_v51 = vadd.f32 %v2831_v0, %v2329_v43 }
 0xc2b   :  { %2289 = vst [vmem:[#allocation10 + $0x8] sm:$0xff] %v2287_v24 }
 0xc2c   :  { %2288 = vst [vmem:[#allocation10] sm:$0xff] %v2286_v51 }
 0xc2d   :  { %2978 = shalt.err (!%p2975_p8)
}
 0xc2e   :  { %s2979_s18 = scalar_lea.hbm %s3313_s4, 256 }
 0xc2f   :  { %p2980_p9 = scmp.ne.s32.totalorder %s3313_s4, %s2979_s18  ;;  %p2983_p10 = scmp.lt.u32.totalorder %s2979_s18, %s3313_s4 }
 0xc31   :  { %p2985_p11 = pnand %p2983_p10, %p2980_p9 }
 0xc33   :  { %2988 = shalt.err (!%p2985_p11)
}
 0xc34   :  { %2301 = dma.vmem_to_hbm [thread:$0]  %s2296_s14, 256, %s3313_s4, [#allocation4], %s3001_s1, %s3001_s1, %s3002_s13  }
 0xc35   :  { %2995 = dma.done.wait [#allocation4], 256  }
 0xc36   :  { %2996 = vsyncadd [#allocation4], 4294967040 }
 0xc37   :  { %2305 = vsyncpa [#allocation3], 1 }
 0xc38   :  { %2306 = vsyncpa [#allocation6], 1 }
 0xc39   :  { %2307 = vsyncpa [#allocation9], 1 }
 0xc3a   :  { %2308 = vsyncpa [#allocation4], 1 }

</bundles_post_ra>
